<compile_context>
chip_gen: v7x
topology: tpu7x:2x2x1
jax: 0.10.0
libtpu: 0.0.40
codegen_flags: <defaults>
</compile_context>

<pallas_src>
import functools

import jax
import jax.numpy as jnp
from jax import lax
from jax.experimental import pallas as pl
from jax.experimental.pallas import tpu as pltpu


def char_lstm_kernel(idx_ref, emb_ref, w_ih_t_ref, w_hh_t_ref, b_ref, h_out_ref,
                     *, batch, seq):
    B, S = batch, seq
    n_char, D = emb_ref.shape
    H = h_out_ref.shape[-1]

    emb = emb_ref[...]          # (n_char, D)
    w_ih_t = w_ih_t_ref[...]    # (D, 4H)
    w_hh_t = w_hh_t_ref[...]    # (H, 4H)
    b = b_ref[...]              # (1, 4H)

    # ---- hoisted input path (runs once, outside the recurrence) ------------
    # Fused gate table: row v = emb[v] @ W_ih^T + (b_ih + b_hh)   -> (n_char, 4H)
    gate_table = jnp.dot(emb, w_ih_t, preferred_element_type=jnp.float32) + b

    # One-hot "gather" for every (t, b) position in one shot; row r = t*B + b.
    idx_sb = idx_ref[...]                                           # (S*B, 1) int32
    vocab_iota = lax.broadcasted_iota(jnp.int32, (S * B, n_char), 1)
    one_hot = (idx_sb == vocab_iota).astype(jnp.float32)            # (S*B, n_char)

    # Input-gate contributions for all timesteps in a single MXU pass.
    gates_x = jnp.dot(one_hot, gate_table,
                      preferred_element_type=jnp.float32)           # (S*B, 4H)

    # ---- serial recurrence (fully unrolled; only h @ W_hh^T + pointwise) ---
    h = jnp.zeros((B, H), jnp.float32)
    c = jnp.zeros((B, H), jnp.float32)
    for t in range(S):  # full unroll: S is a small static constant
        gates = gates_x[t * B:(t + 1) * B, :] + jnp.dot(
            h, w_hh_t, preferred_element_type=jnp.float32)          # (B, 4H)
        sig = jax.nn.sigmoid(gates)          # one full-vreg EUP pass (4H = 128 lanes)
        g_g = jnp.tanh(gates[:, 2 * H:3 * H])
        i_g = sig[:, 0:H]
        f_g = sig[:, H:2 * H]
        o_g = sig[:, 3 * H:4 * H]
        c = f_g * c + i_g * g_g
        h = o_g * jnp.tanh(c)

    h_out_ref[...] = h


def char_lstm_forward(idx, emb, w_ih, w_hh, b_ih, b_hh):
    """idx: (B, S) int32 token indices.

    Returns h_n of shape (1, B, H): PyTorch's `_, h = lstm(x); return h[0]`
    gives h_n with shape (num_layers=1, B, H).
    """
    B, S = idx.shape
    H = w_hh.shape[1]
    b = (b_ih + b_hh).reshape(1, 4 * H).astype(jnp.float32)
    # Time-major flattening so kernel row s*B + b holds idx[b, s].
    idx_sb = jnp.transpose(idx).reshape(S * B, 1).astype(jnp.int32)

    kernel = functools.partial(char_lstm_kernel, batch=B, seq=S)
    h_n = pl.pallas_call(
        kernel,
        out_shape=jax.ShapeDtypeStruct((B, H), jnp.float32),
        in_specs=[pl.BlockSpec(memory_space=pltpu.MemorySpace.VMEM)] * 5,
        out_specs=pl.BlockSpec(memory_space=pltpu.MemorySpace.VMEM),
    )(idx_sb,
      emb.astype(jnp.float32),
      jnp.transpose(w_ih).astype(jnp.float32),   # (D, 4H)
      jnp.transpose(w_hh).astype(jnp.float32),   # (H, 4H)
      b)
    return h_n[None]  # (1, B, H)


if __name__ == "__main__":
    # Small, deterministic configuration consistent with CharLSTM.__init__.
    n_char, char_dim, char_hidden = 50, 16, 32
    batch, seq = 2, 8

    key = jax.random.PRNGKey(0)
    k_idx, k_emb, k_wih, k_whh, k_bih, k_bhh = jax.random.split(key, 6)

    # nn.Embedding(n_char, char_dim): weight ~ N(0, 1)
    emb = jax.random.normal(k_emb, (n_char, char_dim), dtype=jnp.float32)

    # nn.LSTM(char_dim, char_hidden): params ~ U(-1/sqrt(H), 1/sqrt(H)),
    # gate order [i, f, g, o], weight_ih: (4H, D), weight_hh: (4H, H).
    bound = 1.0 / jnp.sqrt(jnp.float32(char_hidden))
    w_ih = jax.random.uniform(k_wih, (4 * char_hidden, char_dim),
                              minval=-bound, maxval=bound, dtype=jnp.float32)
    w_hh = jax.random.uniform(k_whh, (4 * char_hidden, char_hidden),
                              minval=-bound, maxval=bound, dtype=jnp.float32)
    b_ih = jax.random.uniform(k_bih, (4 * char_hidden,),
                              minval=-bound, maxval=bound, dtype=jnp.float32)
    b_hh = jax.random.uniform(k_bhh, (4 * char_hidden,),
                              minval=-bound, maxval=bound, dtype=jnp.float32)

    # Input: character indices (batch, seq).
    x = jax.random.randint(k_idx, (batch, seq), 0, n_char, dtype=jnp.int32)

    h_n = char_lstm_forward(x, emb, w_ih, w_hh, b_ih, b_hh)
    jax.block_until_ready(h_n)

    assert h_n.shape == (1, batch, char_hidden), h_n.shape
    print("KERNEL_OK")
</pallas_src>

<mosaic_0001>
module attributes {stable_mosaic.version = 11 : i64} {
  func.func @char_lstm_kernel(%arg0: memref<16x1xi32, #tpu.memory_space<vmem>>, %arg1: memref<50x16xf32, #tpu.memory_space<vmem>>, %arg2: memref<16x128xf32, #tpu.memory_space<vmem>>, %arg3: memref<32x128xf32, #tpu.memory_space<vmem>>, %arg4: memref<1x128xf32, #tpu.memory_space<vmem>>, %arg5: memref<2x32xf32, #tpu.memory_space<vmem>>) attributes {dimension_semantics = [], scalar_prefetch = 0 : i64, scratch_operands = 0 : i64, tpu.core_type = #tpu.core_type<tc>} {
    %c0 = arith.constant 0 : index
    %c0_0 = arith.constant 0 : index
    %0 = vector.load %arg1[%c0, %c0_0] : memref<50x16xf32, #tpu.memory_space<vmem>>, vector<50x16xf32>
    %c0_1 = arith.constant 0 : index
    %c0_2 = arith.constant 0 : index
    %1 = vector.load %arg2[%c0_1, %c0_2] : memref<16x128xf32, #tpu.memory_space<vmem>>, vector<16x128xf32>
    %c0_3 = arith.constant 0 : index
    %c0_4 = arith.constant 0 : index
    %2 = vector.load %arg3[%c0_3, %c0_4] : memref<32x128xf32, #tpu.memory_space<vmem>>, vector<32x128xf32>
    %c0_5 = arith.constant 0 : index
    %c0_6 = arith.constant 0 : index
    %3 = vector.load %arg4[%c0_5, %c0_6] : memref<1x128xf32, #tpu.memory_space<vmem>>, vector<1x128xf32>
    %cst = arith.constant dense<0.000000e+00> : vector<50x128xf32>
    %4 = tpu.matmul %0, %1, %cst {dimension_numbers = #tpu.dot_dimension_numbers<[1], [0], [0], [1], [0, 0, 1, 1], [], []>} : vector<50x16xf32>, vector<16x128xf32>, vector<50x128xf32> -> vector<50x128xf32>
    %5 = vector.broadcast %3 : vector<1x128xf32> to vector<50x128xf32>
    %6 = arith.addf %4, %5 : vector<50x128xf32>
    %c0_7 = arith.constant 0 : index
    %c0_8 = arith.constant 0 : index
    %7 = vector.load %arg0[%c0_7, %c0_8] : memref<16x1xi32, #tpu.memory_space<vmem>>, vector<16x1xi32>
    %8 = tpu.iota {dimensions = array<i32: 1>} : vector<16x50xi32>
    %9 = vector.broadcast %7 : vector<16x1xi32> to vector<16x50xi32>
    %10 = arith.cmpi eq, %9, %8 : vector<16x50xi32>
    %11 = arith.extui %10 : vector<16x50xi1> to vector<16x50xi32>
    %12 = arith.sitofp %11 : vector<16x50xi32> to vector<16x50xf32>
    %cst_9 = arith.constant dense<0.000000e+00> : vector<16x128xf32>
    %13 = tpu.matmul %12, %6, %cst_9 {dimension_numbers = #tpu.dot_dimension_numbers<[1], [0], [0], [1], [0, 0, 1, 1], [], []>} : vector<16x50xf32>, vector<50x128xf32>, vector<16x128xf32> -> vector<16x128xf32>
    %cst_10 = arith.constant 0.000000e+00 : f32
    %14 = vector.broadcast %cst_10 : f32 to vector<2x32xf32>
    %cst_11 = arith.constant 0.000000e+00 : f32
    %15 = vector.broadcast %cst_11 : f32 to vector<2x32xf32>
    %16 = vector.extract_strided_slice %13 {offsets = [0, 0], sizes = [2, 128], strides = [1, 1]} : vector<16x128xf32> to vector<2x128xf32>
    %cst_12 = arith.constant dense<0.000000e+00> : vector<2x128xf32>
    %17 = tpu.matmul %14, %2, %cst_12 {dimension_numbers = #tpu.dot_dimension_numbers<[1], [0], [0], [1], [0, 0, 1, 1], [], []>} : vector<2x32xf32>, vector<32x128xf32>, vector<2x128xf32> -> vector<2x128xf32>
    %18 = arith.addf %16, %17 : vector<2x128xf32>
    %19 = arith.negf %18 : vector<2x128xf32>
    %20 = math.exp %19 : vector<2x128xf32>
    %cst_13 = arith.constant 1.000000e+00 : f32
    %21 = vector.broadcast %cst_13 : f32 to vector<2x128xf32>
    %22 = arith.addf %21, %20 : vector<2x128xf32>
    %23 = arith.divf %21, %22 : vector<2x128xf32>
    %24 = vector.extract_strided_slice %18 {offsets = [0, 64], sizes = [2, 32], strides = [1, 1]} : vector<2x128xf32> to vector<2x32xf32>
    %25 = math.tanh %24 : vector<2x32xf32>
    %26 = vector.extract_strided_slice %23 {offsets = [0, 0], sizes = [2, 32], strides = [1, 1]} : vector<2x128xf32> to vector<2x32xf32>
    %27 = vector.extract_strided_slice %23 {offsets = [0, 32], sizes = [2, 32], strides = [1, 1]} : vector<2x128xf32> to vector<2x32xf32>
    %28 = vector.extract_strided_slice %23 {offsets = [0, 96], sizes = [2, 32], strides = [1, 1]} : vector<2x128xf32> to vector<2x32xf32>
    %29 = arith.mulf %27, %15 : vector<2x32xf32>
    %30 = arith.mulf %26, %25 : vector<2x32xf32>
    %31 = arith.addf %29, %30 : vector<2x32xf32>
    %32 = math.tanh %31 : vector<2x32xf32>
    %33 = arith.mulf %28, %32 : vector<2x32xf32>
    %34 = vector.extract_strided_slice %13 {offsets = [2, 0], sizes = [2, 128], strides = [1, 1]} : vector<16x128xf32> to vector<2x128xf32>
    %cst_14 = arith.constant dense<0.000000e+00> : vector<2x128xf32>
    %35 = tpu.matmul %33, %2, %cst_14 {dimension_numbers = #tpu.dot_dimension_numbers<[1], [0], [0], [1], [0, 0, 1, 1], [], []>} : vector<2x32xf32>, vector<32x128xf32>, vector<2x128xf32> -> vector<2x128xf32>
    %36 = arith.addf %34, %35 : vector<2x128xf32>
    %37 = arith.negf %36 : vector<2x128xf32>
    %38 = math.exp %37 : vector<2x128xf32>
    %cst_15 = arith.constant 1.000000e+00 : f32
    %39 = vector.broadcast %cst_15 : f32 to vector<2x128xf32>
    %40 = arith.addf %39, %38 : vector<2x128xf32>
    %41 = arith.divf %39, %40 : vector<2x128xf32>
    %42 = vector.extract_strided_slice %36 {offsets = [0, 64], sizes = [2, 32], strides = [1, 1]} : vector<2x128xf32> to vector<2x32xf32>
    %43 = math.tanh %42 : vector<2x32xf32>
    %44 = vector.extract_strided_slice %41 {offsets = [0, 0], sizes = [2, 32], strides = [1, 1]} : vector<2x128xf32> to vector<2x32xf32>
    %45 = vector.extract_strided_slice %41 {offsets = [0, 32], sizes = [2, 32], strides = [1, 1]} : vector<2x128xf32> to vector<2x32xf32>
    %46 = vector.extract_strided_slice %41 {offsets = [0, 96], sizes = [2, 32], strides = [1, 1]} : vector<2x128xf32> to vector<2x32xf32>
    %47 = arith.mulf %45, %31 : vector<2x32xf32>
    %48 = arith.mulf %44, %43 : vector<2x32xf32>
    %49 = arith.addf %47, %48 : vector<2x32xf32>
    %50 = math.tanh %49 : vector<2x32xf32>
    %51 = arith.mulf %46, %50 : vector<2x32xf32>
    %52 = vector.extract_strided_slice %13 {offsets = [4, 0], sizes = [2, 128], strides = [1, 1]} : vector<16x128xf32> to vector<2x128xf32>
    %cst_16 = arith.constant dense<0.000000e+00> : vector<2x128xf32>
    %53 = tpu.matmul %51, %2, %cst_16 {dimension_numbers = #tpu.dot_dimension_numbers<[1], [0], [0], [1], [0, 0, 1, 1], [], []>} : vector<2x32xf32>, vector<32x128xf32>, vector<2x128xf32> -> vector<2x128xf32>
    %54 = arith.addf %52, %53 : vector<2x128xf32>
    %55 = arith.negf %54 : vector<2x128xf32>
    %56 = math.exp %55 : vector<2x128xf32>
    %cst_17 = arith.constant 1.000000e+00 : f32
    %57 = vector.broadcast %cst_17 : f32 to vector<2x128xf32>
    %58 = arith.addf %57, %56 : vector<2x128xf32>
    %59 = arith.divf %57, %58 : vector<2x128xf32>
    %60 = vector.extract_strided_slice %54 {offsets = [0, 64], sizes = [2, 32], strides = [1, 1]} : vector<2x128xf32> to vector<2x32xf32>
    %61 = math.tanh %60 : vector<2x32xf32>
    %62 = vector.extract_strided_slice %59 {offsets = [0, 0], sizes = [2, 32], strides = [1, 1]} : vector<2x128xf32> to vector<2x32xf32>
    %63 = vector.extract_strided_slice %59 {offsets = [0, 32], sizes = [2, 32], strides = [1, 1]} : vector<2x128xf32> to vector<2x32xf32>
    %64 = vector.extract_strided_slice %59 {offsets = [0, 96], sizes = [2, 32], strides = [1, 1]} : vector<2x128xf32> to vector<2x32xf32>
    %65 = arith.mulf %63, %49 : vector<2x32xf32>
    %66 = arith.mulf %62, %61 : vector<2x32xf32>
    %67 = arith.addf %65, %66 : vector<2x32xf32>
    %68 = math.tanh %67 : vector<2x32xf32>
    %69 = arith.mulf %64, %68 : vector<2x32xf32>
    %70 = vector.extract_strided_slice %13 {offsets = [6, 0], sizes = [2, 128], strides = [1, 1]} : vector<16x128xf32> to vector<2x128xf32>
    %cst_18 = arith.constant dense<0.000000e+00> : vector<2x128xf32>
    %71 = tpu.matmul %69, %2, %cst_18 {dimension_numbers = #tpu.dot_dimension_numbers<[1], [0], [0], [1], [0, 0, 1, 1], [], []>} : vector<2x32xf32>, vector<32x128xf32>, vector<2x128xf32> -> vector<2x128xf32>
    %72 = arith.addf %70, %71 : vector<2x128xf32>
    %73 = arith.negf %72 : vector<2x128xf32>
    %74 = math.exp %73 : vector<2x128xf32>
    %cst_19 = arith.constant 1.000000e+00 : f32
    %75 = vector.broadcast %cst_19 : f32 to vector<2x128xf32>
    %76 = arith.addf %75, %74 : vector<2x128xf32>
    %77 = arith.divf %75, %76 : vector<2x128xf32>
    %78 = vector.extract_strided_slice %72 {offsets = [0, 64], sizes = [2, 32], strides = [1, 1]} : vector<2x128xf32> to vector<2x32xf32>
    %79 = math.tanh %78 : vector<2x32xf32>
    %80 = vector.extract_strided_slice %77 {offsets = [0, 0], sizes = [2, 32], strides = [1, 1]} : vector<2x128xf32> to vector<2x32xf32>
    %81 = vector.extract_strided_slice %77 {offsets = [0, 32], sizes = [2, 32], strides = [1, 1]} : vector<2x128xf32> to vector<2x32xf32>
    %82 = vector.extract_strided_slice %77 {offsets = [0, 96], sizes = [2, 32], strides = [1, 1]} : vector<2x128xf32> to vector<2x32xf32>
    %83 = arith.mulf %81, %67 : vector<2x32xf32>
    %84 = arith.mulf %80, %79 : vector<2x32xf32>
    %85 = arith.addf %83, %84 : vector<2x32xf32>
    %86 = math.tanh %85 : vector<2x32xf32>
    %87 = arith.mulf %82, %86 : vector<2x32xf32>
    %88 = vector.extract_strided_slice %13 {offsets = [8, 0], sizes = [2, 128], strides = [1, 1]} : vector<16x128xf32> to vector<2x128xf32>
    %cst_20 = arith.constant dense<0.000000e+00> : vector<2x128xf32>
    %89 = tpu.matmul %87, %2, %cst_20 {dimension_numbers = #tpu.dot_dimension_numbers<[1], [0], [0], [1], [0, 0, 1, 1], [], []>} : vector<2x32xf32>, vector<32x128xf32>, vector<2x128xf32> -> vector<2x128xf32>
    %90 = arith.addf %88, %89 : vector<2x128xf32>
    %91 = arith.negf %90 : vector<2x128xf32>
    %92 = math.exp %91 : vector<2x128xf32>
    %cst_21 = arith.constant 1.000000e+00 : f32
    %93 = vector.broadcast %cst_21 : f32 to vector<2x128xf32>
    %94 = arith.addf %93, %92 : vector<2x128xf32>
    %95 = arith.divf %93, %94 : vector<2x128xf32>
    %96 = vector.extract_strided_slice %90 {offsets = [0, 64], sizes = [2, 32], strides = [1, 1]} : vector<2x128xf32> to vector<2x32xf32>
    %97 = math.tanh %96 : vector<2x32xf32>
    %98 = vector.extract_strided_slice %95 {offsets = [0, 0], sizes = [2, 32], strides = [1, 1]} : vector<2x128xf32> to vector<2x32xf32>
    %99 = vector.extract_strided_slice %95 {offsets = [0, 32], sizes = [2, 32], strides = [1, 1]} : vector<2x128xf32> to vector<2x32xf32>
    %100 = vector.extract_strided_slice %95 {offsets = [0, 96], sizes = [2, 32], strides = [1, 1]} : vector<2x128xf32> to vector<2x32xf32>
    %101 = arith.mulf %99, %85 : vector<2x32xf32>
    %102 = arith.mulf %98, %97 : vector<2x32xf32>
    %103 = arith.addf %101, %102 : vector<2x32xf32>
    %104 = math.tanh %103 : vector<2x32xf32>
    %105 = arith.mulf %100, %104 : vector<2x32xf32>
    %106 = vector.extract_strided_slice %13 {offsets = [10, 0], sizes = [2, 128], strides = [1, 1]} : vector<16x128xf32> to vector<2x128xf32>
    %cst_22 = arith.constant dense<0.000000e+00> : vector<2x128xf32>
    %107 = tpu.matmul %105, %2, %cst_22 {dimension_numbers = #tpu.dot_dimension_numbers<[1], [0], [0], [1], [0, 0, 1, 1], [], []>} : vector<2x32xf32>, vector<32x128xf32>, vector<2x128xf32> -> vector<2x128xf32>
    %108 = arith.addf %106, %107 : vector<2x128xf32>
    %109 = arith.negf %108 : vector<2x128xf32>
    %110 = math.exp %109 : vector<2x128xf32>
    %cst_23 = arith.constant 1.000000e+00 : f32
    %111 = vector.broadcast %cst_23 : f32 to vector<2x128xf32>
    %112 = arith.addf %111, %110 : vector<2x128xf32>
    %113 = arith.divf %111, %112 : vector<2x128xf32>
    %114 = vector.extract_strided_slice %108 {offsets = [0, 64], sizes = [2, 32], strides = [1, 1]} : vector<2x128xf32> to vector<2x32xf32>
    %115 = math.tanh %114 : vector<2x32xf32>
    %116 = vector.extract_strided_slice %113 {offsets = [0, 0], sizes = [2, 32], strides = [1, 1]} : vector<2x128xf32> to vector<2x32xf32>
    %117 = vector.extract_strided_slice %113 {offsets = [0, 32], sizes = [2, 32], strides = [1, 1]} : vector<2x128xf32> to vector<2x32xf32>
    %118 = vector.extract_strided_slice %113 {offsets = [0, 96], sizes = [2, 32], strides = [1, 1]} : vector<2x128xf32> to vector<2x32xf32>
    %119 = arith.mulf %117, %103 : vector<2x32xf32>
    %120 = arith.mulf %116, %115 : vector<2x32xf32>
    %121 = arith.addf %119, %120 : vector<2x32xf32>
    %122 = math.tanh %121 : vector<2x32xf32>
    %123 = arith.mulf %118, %122 : vector<2x32xf32>
    %124 = vector.extract_strided_slice %13 {offsets = [12, 0], sizes = [2, 128], strides = [1, 1]} : vector<16x128xf32> to vector<2x128xf32>
    %cst_24 = arith.constant dense<0.000000e+00> : vector<2x128xf32>
    %125 = tpu.matmul %123, %2, %cst_24 {dimension_numbers = #tpu.dot_dimension_numbers<[1], [0], [0], [1], [0, 0, 1, 1], [], []>} : vector<2x32xf32>, vector<32x128xf32>, vector<2x128xf32> -> vector<2x128xf32>
    %126 = arith.addf %124, %125 : vector<2x128xf32>
    %127 = arith.negf %126 : vector<2x128xf32>
    %128 = math.exp %127 : vector<2x128xf32>
    %cst_25 = arith.constant 1.000000e+00 : f32
    %129 = vector.broadcast %cst_25 : f32 to vector<2x128xf32>
    %130 = arith.addf %129, %128 : vector<2x128xf32>
    %131 = arith.divf %129, %130 : vector<2x128xf32>
    %132 = vector.extract_strided_slice %126 {offsets = [0, 64], sizes = [2, 32], strides = [1, 1]} : vector<2x128xf32> to vector<2x32xf32>
    %133 = math.tanh %132 : vector<2x32xf32>
    %134 = vector.extract_strided_slice %131 {offsets = [0, 0], sizes = [2, 32], strides = [1, 1]} : vector<2x128xf32> to vector<2x32xf32>
    %135 = vector.extract_strided_slice %131 {offsets = [0, 32], sizes = [2, 32], strides = [1, 1]} : vector<2x128xf32> to vector<2x32xf32>
    %136 = vector.extract_strided_slice %131 {offsets = [0, 96], sizes = [2, 32], strides = [1, 1]} : vector<2x128xf32> to vector<2x32xf32>
    %137 = arith.mulf %135, %121 : vector<2x32xf32>
    %138 = arith.mulf %134, %133 : vector<2x32xf32>
    %139 = arith.addf %137, %138 : vector<2x32xf32>
    %140 = math.tanh %139 : vector<2x32xf32>
    %141 = arith.mulf %136, %140 : vector<2x32xf32>
    %142 = vector.extract_strided_slice %13 {offsets = [14, 0], sizes = [2, 128], strides = [1, 1]} : vector<16x128xf32> to vector<2x128xf32>
    %cst_26 = arith.constant dense<0.000000e+00> : vector<2x128xf32>
    %143 = tpu.matmul %141, %2, %cst_26 {dimension_numbers = #tpu.dot_dimension_numbers<[1], [0], [0], [1], [0, 0, 1, 1], [], []>} : vector<2x32xf32>, vector<32x128xf32>, vector<2x128xf32> -> vector<2x128xf32>
    %144 = arith.addf %142, %143 : vector<2x128xf32>
    %145 = arith.negf %144 : vector<2x128xf32>
    %146 = math.exp %145 : vector<2x128xf32>
    %cst_27 = arith.constant 1.000000e+00 : f32
    %147 = vector.broadcast %cst_27 : f32 to vector<2x128xf32>
    %148 = arith.addf %147, %146 : vector<2x128xf32>
    %149 = arith.divf %147, %148 : vector<2x128xf32>
    %150 = vector.extract_strided_slice %144 {offsets = [0, 64], sizes = [2, 32], strides = [1, 1]} : vector<2x128xf32> to vector<2x32xf32>
    %151 = math.tanh %150 : vector<2x32xf32>
    %152 = vector.extract_strided_slice %149 {offsets = [0, 0], sizes = [2, 32], strides = [1, 1]} : vector<2x128xf32> to vector<2x32xf32>
    %153 = vector.extract_strided_slice %149 {offsets = [0, 32], sizes = [2, 32], strides = [1, 1]} : vector<2x128xf32> to vector<2x32xf32>
    %154 = vector.extract_strided_slice %149 {offsets = [0, 96], sizes = [2, 32], strides = [1, 1]} : vector<2x128xf32> to vector<2x32xf32>
    %155 = arith.mulf %153, %139 : vector<2x32xf32>
    %156 = arith.mulf %152, %151 : vector<2x32xf32>
    %157 = arith.addf %155, %156 : vector<2x32xf32>
    %158 = math.tanh %157 : vector<2x32xf32>
    %159 = arith.mulf %154, %158 : vector<2x32xf32>
    %c0_28 = arith.constant 0 : index
    %c0_29 = arith.constant 0 : index
    %160 = vector.load %arg5[%c0_28, %c0_29] : memref<2x32xf32, #tpu.memory_space<vmem>>, vector<2x32xf32>
    tpu.vector_store %arg5[%c0_28, %c0_29], %159 {strides = array<i32>} : memref<2x32xf32, #tpu.memory_space<vmem>>, vector<2x32xf32>,
    return
  }
}

</mosaic_0001>

<bundles_post_ra>
// kernel: tpu_custom_call.1
= control target key start
LH: loop header
LB: loop body
LE: loop exit
PB: predicated region body
PF: predicated region fallthrough
CT: control target
= control target key end

     0   :  { %v1503_v2 = vmov 0.0|0.0   ;;  %vm1504_vm0 = vmmov 0   ;;  %v1505_v4 = vmov 0.0   ;;  %v1506_v5 = vmov 0   ;;  %s1730_s0 = inlined_call_operand.vmem [shape: s32[16,1], index: 0, kind: input, shape index: {}]   ;;  %s1731_s1 = inlined_call_operand.vmem [shape: f32[50,16], index: 1, kind: input, shape index: {}]   ;;  %s1732_s2 = inlined_call_operand.vmem [shape: f32[16,128], index: 2, kind: input, shape index: {}]   ;;  %s1733_s3 = inlined_call_operand.vmem [shape: f32[32,128], index: 3, kind: input, shape index: {}]   ;;  %s1734_s4 = inlined_call_operand.vmem [shape: f32[1,128], index: 4, kind: input, shape index: {}]   ;;  %s1735_s5 = inlined_call_operand.hbm [shape: f32[2,32], index: 5, kind: output, shape index: {}]  }
   0x1   :  { %v28_v0 = vld [vmem:[%s1732_s2] sm:$0xff]  ;;  %v29_v1 = vld [vmem:[%s1732_s2 + $0x8] sm:$0xff]  ;;  %1344 = vmatprep.subr.bf16.mxu0 %v1503_v2  ;;  %1218 = vmatprep.mubr.msk.f32.mxu0 %vm1504_vm0, %v1505_v4  ;;  %vm41_vm1 = vcmask 130048  }
   0x2   :  { %v1345_v3 = vpack.c.bf16 %v29_v1, %v28_v0  ;;  %1414 = vset.pattern.permute.xlu0 %v1506_v5  ;;  %v21_v6 = vld [vmem:[%s1731_s1] sm:$0xff] }
   0x3   :  { %v163_v7 = vld [vmem:[%s1730_s0] sm:$0xff] }
   0x4   :  { %1346 = vmatpush3.bf16.msra.mxu0 %v1345_v3  ;;  %168 = vperm.xlu0 %1414, %v163_v7  }
   0x5   :  { %1371 = vmatprep.subr.bf16.mxu0 %v1503_v2 }
   0x6   :  { %10 = vsyncpa [#allocation3], 0  ;;  %v164_v8 = vld [vmem:[%s1730_s0 + $0x8] sm:$0xff]  ;;  %v23_v10 = vld [vmem:[%s1731_s1 + $0x10] sm:$0xff]  ;;  %v165_v21 = vlaneseq  ;;  %vm179_vm2 = vcmask 408576   ;;  %vm186_vm4 = vcmask 1041408  }
   0x7   :  { %1219 = vmatmul.mubr.msk.f32.vlgmr.msra.gmra.mrb[0].mxu0 %vm41_vm1, %v21_v6  ;;  %v22_v9 = vld [vmem:[%s1731_s1 + $0x8] sm:$0xff]  ;;  %v24_v11 = vld [vmem:[%s1731_s1 + $0x18] sm:$0xff]  ;;  %v25_v12 = vld [vmem:[%s1731_s1 + $0x20] sm:$0xff]  ;;  %s1508_s21 = smov 32   ;;  %vm265_vm6 = vcmask 261120   ;;  %s1509_s22 = smov [#allocation2]  }
   0x8   :  { %1221 = vmatprep.mubr.msk.f32.mxu0 %vm1504_vm0, %v1505_v4  ;;  %171 = vperm.xlu0 %1414, %v164_v8   ;;  %v26_v13 = vld [vmem:[%s1731_s1 + $0x28] sm:$0xff]  ;;  %v27_v14 = vld [vmem:[%s1731_s1 + $0x30] sm:$0x3]  ;;  %v30_v15 = vld [vmem:[%s1733_s3] sm:$0xff]  ;;  %v166_v22 = vand.u32 127, %v165_v21  ;;  %s1120_s23 = sshll.u32 %s1509_s22, 4  ;;  %s1121_s23 = int_to_ptr.vmem [resolvable:$true] %s1120_s23 }
   0x9   :  { %v31_v16 = vld [vmem:[%s1733_s3 + $0x8] sm:$0xff]  ;;  %v32_v18 = vld [vmem:[%s1733_s3 + $0x10] sm:$0xff]  ;;  %v33_v19 = vld [vmem:[%s1733_s3 + $0x18] sm:$0xff]  ;;  %vm1112_vm7 = vcmask 261126   ;;  %s1479_s24 = scalar_lea.vmem %s1121_s23, 32  ;;  %p1484_p1 = scmp.lt.s32.totalorder %s1121_s23, %s1121_s23 }
   0xa   :  { %v1604_v17 = vpack.c.bf16 %v31_v16, %v30_v15  ;;  %v1614_v20 = vpack.c.bf16 %v33_v19, %v32_v18  ;;  %v1128_v27 = vld [vmem:[%s1734_s4] ss:$0 sm:$0xff]  ;;  %s1507_s4 = smov 64   ;;  %p1480_p0 = scmp.ne.s32.totalorder %s1121_s23, %s1479_s24 }
   0xb   :  { %1222 = vmatmul.mubr.msk.f32.gmra.mrb[2].mxu0 %vm41_vm1, %v22_v9  ;;  %p1485_p2 = scmp.lt.s32.totalorder %s1479_s24, %s1479_s24 }
   0xc   :  { %1224 = vmatprep.mubr.msk.f32.mxu0 %vm1504_vm0, %v1505_v4  ;;  %1373 = vmatpush3.bf16.msra.mxu0 %v1604_v17 }
   0xd   :  { %1374 = vmatprep.subr.bf16.mxu0 %v1503_v2  ;;  %p1486_p3 = por %p1485_p2, %p1484_p1 }
   0xf   :  { %1225 = vmatmul.mubr.msk.f32.gmra.mrb[4].mxu0 %vm41_vm1, %v23_v10  ;;  %p1487_p4 = pnand %p1486_p3, %p1480_p0 }
  0x10   :  { %1227 = vmatprep.mubr.msk.f32.mxu0 %vm1504_vm0, %v1505_v4  ;;  %1376 = vmatpush3.bf16.msra.mxu0 %v1614_v20 }
  0x11   :  { %1383 = vmatprep.subr.bf16.mxu0 %v1503_v2 }
  0x13   :  { %1228 = vmatmul.mubr.msk.f32.gmra.mrb[6].mxu0 %vm41_vm1, %v24_v11 }
  0x14   :  { %1230 = vmatprep.mubr.msk.f32.mxu0 %vm1504_vm0, %v1505_v4 }
  0x17   :  { %1231 = vmatmul.mubr.msk.f32.gmra.mrb[8].mxu0 %vm41_vm1, %v25_v12 }
  0x18   :  { %1233 = vmatprep.mubr.msk.f32.mxu0 %vm1504_vm0, %v1505_v4 }
  0x1b   :  { %1234 = vmatmul.mubr.msk.f32.gmra.mrb[10].mxu0 %vm41_vm1, %v26_v13 }
  0x1c   :  { %1236 = vmatprep.mubr.msk.f32.mxu0 %vm1504_vm0, %v1505_v4 }
  0x1f   :  { %1237 = vmatmul.mubr.msk.f32.gmra.mrb[12].mxu0 %vm41_vm1, %v27_v14 }
  0x20   :  { %1286 = vmatprep.mubr.msk.f32.mxu0 %vm1504_vm0, %v1505_v4 }
  0x83   :  { %v169_v23 = vpop.permute.xlu0 %168 }
  0x84   :  { %vm173_vm3 = vcmp.eq.s32.totalorder %v169_v23, %v166_v22 }
  0x85   :  { %v1136_v24 = vsel %vm173_vm3, 1.0, %v1505_v4 }
  0x86   :  { %1253 = vmatprep.mubr.msk.f32.mxu1 %vm179_vm2, %v1136_v24 }
  0x87   :  { %v172_v47 = vpop.permute.xlu0 %171 }
  0x88   :  { %vm174_vm5 = vcmp.eq.s32.totalorder %v172_v47, %v166_v22 }
  0x89   :  { %v1137_v51 = vsel %vm174_vm5, 1.0, %v1505_v4 }
  0xda   :  { %v129_v25 = vpop.f32.mrb[0].mxu0 }
  0xdb   :  { %v1220_v26 = vpop.f32.mrb[1].mxu0  ;;  %v130_v29 = vadd.f32 %v1128_v27, %v129_v25 }
  0xde   :  { %v134_v28 = vpop.f32.mrb[2].mxu0 }
  0xdf   :  { %v135_v30 = vadd.f32 %v1128_v27, %v134_v28  ;;  %v1223_v31 = vpop.f32.mrb[3].mxu0 }
  0xe1   :  { %v1347_v32 = vpack.c.bf16 %v135_v30, %v130_v29 }
  0xe2   :  { %v139_v33 = vpop.f32.mrb[4].mxu0 }
  0xe3   :  { %v1226_v34 = vpop.f32.mrb[5].mxu0  ;;  %1348 = vmatprep.subr.bf16.mxu1 %v1347_v32  ;;  %v140_v36 = vadd.f32 %v1128_v27, %v139_v33 }
  0xe4   :  { %1350 = vmatpush3.bf16.msra.mxu1 %v1347_v32 }
  0xe6   :  { %v144_v35 = vpop.f32.mrb[6].mxu0 }
  0xe7   :  { %v145_v37 = vadd.f32 %v1128_v27, %v144_v35  ;;  %v1229_v38 = vpop.f32.mrb[7].mxu0 }
  0xe9   :  { %v1351_v39 = vpack.c.bf16 %v145_v37, %v140_v36 }
  0xea   :  { %v149_v40 = vpop.f32.mrb[8].mxu0 }
  0xeb   :  { %v1232_v41 = vpop.f32.mrb[9].mxu0  ;;  %1352 = vmatprep.subr.bf16.mxu1 %v1351_v39  ;;  %v150_v43 = vadd.f32 %v1128_v27, %v149_v40 }
  0xec   :  { %1354 = vmatpush3.bf16.msra.mxu1 %v1351_v39 }
  0xee   :  { %v154_v42 = vpop.f32.mrb[10].mxu0 }
  0xef   :  { %v155_v44 = vadd.f32 %v1128_v27, %v154_v42  ;;  %v1235_v45 = vpop.f32.mrb[11].mxu0 }
  0xf1   :  { %v1355_v46 = vpack.c.bf16 %v155_v44, %v150_v43 }
  0xf2   :  { %v159_v48 = vpop.f32.mrb[12].mxu0 }
  0xf3   :  { %v160_v49 = vadd.f32 %v1128_v27, %v159_v48  ;;  %1356 = vmatprep.subr.bf16.mxu1 %v1355_v46  ;;  %v1238_v50 = vpop.f32.mrb[13].mxu0 }
  0xf4   :  { %1358 = vmatpush3.bf16.msra.mxu1 %v1355_v46 }
  0xf5   :  { %1251 = vmatprep.subr.msk.mxu1 %vm186_vm4, %v160_v49 }
  0xf8   :  { %1252 = vmatpush3.msk.msra.mxu1 %vm186_vm4, %v160_v49 }
  0xf9   :  { %1254 = vmatmul.mubr.msk.f32.vlgmr.msra.gmra.mrb[0].mxu1 %vm179_vm2, %v1137_v51  ;;  %1359 = vmatprep.subr.bf16.mxu1 %v1503_v2 }
  0xfa   :  { %1361 = vmatpush3.bf16.msra.mxu1 %v1604_v17  ;;  %1264 = vmatprep.mubr.msk.f32.mxu1 %vm1504_vm0, %v1505_v4 }
  0xfb   :  { %1362 = vmatprep.subr.bf16.mxu1 %v1503_v2 }
  0xfe   :  { %1364 = vmatpush3.bf16.msra.mxu1 %v1614_v20 }
  0xff   :  { %1365 = vmatprep.subr.bf16.mxu1 %v1503_v2 }
 0x101   :  { %1265 = vmatmul.mubr.f32.vlgmr.msra.gmra.mrb[2].mxu1 %v1505_v4 }
 0x102   :  { %1367 = vmatpush3.bf16.msra.mxu1 %v1604_v17  ;;  %1275 = vmatprep.mubr.msk.f32.mxu1 %vm1504_vm0, %v1505_v4 }
 0x103   :  { %1368 = vmatprep.subr.bf16.mxu1 %v1503_v2 }
 0x106   :  { %1370 = vmatpush3.bf16.msra.mxu1 %v1614_v20 }
 0x107   :  { %1377 = vmatprep.subr.bf16.mxu1 %v1503_v2 }
 0x1cc   :  { %v1639_v52 = vpop.f32.mrb[0].mxu1 }
 0x1cd   :  { %v1641_v53 = vpop.f32.mrb[1].mxu1 }
 0x1d4   :  { %v335_v54 = vpop.f32.mrb[2].mxu1 }
 0x1d5   :  { %v339_v55 = vadd.f32 %v335_v54, %v1641_v53  ;;  %v1266_v56 = vpop.f32.mrb[3].mxu1 }
 0x1d7   :  { %1415 = vtanh.f32 %v339_v55  ;;  %v1141_v58 = vmul.f32 -1.442695, %v339_v55 }
 0x1d9   :  { %1417 = vpow2.f32 %v1141_v58 }
 0x1e1   :  { %v1416_v57 = vpop.eup %1415 }
 0x1e2   :  { %349 = vrot.lane.b32.xlu1 %v1416_v57, %s1507_s4 }
 0x1e3   :  { %v1418_v59 = vpop.eup %1417 }
 0x1e4   :  { %v343_v60 = vadd.f32 1.0, %v1418_v59 }
 0x1e6   :  { %1419 = vrcp.f32 %v343_v60 }
 0x1f0   :  { %v1420_v61 = vpop.eup %1419 }
 0x1f1   :  { %v347_v0 = vmul.f32 0.0, %v1420_v61 }
 0x254   :  { %v350_v62 = vpop.permute.xlu1 %349 }
 0x255   :  { %v352_v63 = vmul.f32 %v1420_v61, %v350_v62 }
 0x257   :  { %354 = vrot.lane.b32.xlu1 %v352_v63, %s1508_s21 }
 0x2c9   :  { %v355_v1 = vpop.permute.xlu1 %354 }
 0x2ca   :  { %v357_v3 = vadd.f32 %v355_v1, %v347_v0 }
 0x2cc   :  { %1421 = vtanh.f32 %v357_v3  ;;  %v451_v22 = vrot.slane %v357_v3, 6 }
 0x2d6   :  { %v1422_v5 = vpop.eup %1421 }
 0x2d7   :  { %360 = vrot.lane.b32.xlu0 %v1422_v5, %s1507_s4 }
 0x349   :  { %v361_v6 = vpop.permute.xlu0 %360 }
 0x34a   :  { %v363_v7 = vmul.f32 %v1420_v61, %v361_v6 }
 0x34c   :  { %365 = vrot.lane.b32.xlu1 %v363_v7, %s1508_s21 }
 0x3be   :  { %v366_v8 = vpop.permute.xlu1 %365 }
 0x3bf   :  { %1276 = vmatmul.mubr.msk.f32.vlgmr.msra.gmra.mrb[4].mxu1 %vm265_vm6, %v366_v8 }
 0x3c0   :  { %1379 = vmatpush3.bf16.msra.mxu1 %v1604_v17  ;;  %1297 = vmatprep.mubr.msk.f32.mxu1 %vm1504_vm0, %v1505_v4 }
 0x3c1   :  { %1380 = vmatprep.subr.bf16.mxu1 %v1503_v2 }
 0x3c4   :  { %1382 = vmatpush3.bf16.msra.mxu1 %v1614_v20 }
 0x3c5   :  { %1389 = vmatprep.subr.bf16.mxu1 %v1503_v2 }
 0x492   :  { %v435_v9 = vpop.f32.mrb[4].mxu1 }
 0x493   :  { %v440_v10 = vrot.slane %v435_v9, 6  ;;  %v1277_v11 = vpop.f32.mrb[5].mxu1 }
 0x495   :  { %v442_v12 = vadd.f32 %v440_v10, %v1641_v53 }
 0x497   :  { %1423 = vtanh.f32 %v442_v12  ;;  %v1143_v14 = vmul.f32 -1.442695, %v442_v12 }
 0x499   :  { %1425 = vpow2.f32 %v1143_v14 }
 0x4a1   :  { %v1424_v13 = vpop.eup %1423 }
 0x4a2   :  { %455 = vrot.lane.b32.xlu0 %v1424_v13, %s1507_s4 }
 0x4a3   :  { %v1426_v15 = vpop.eup %1425 }
 0x4a4   :  { %v446_v16 = vadd.f32 1.0, %v1426_v15 }
 0x4a6   :  { %1427 = vrcp.f32 %v446_v16 }
 0x4b0   :  { %v1428_v18 = vpop.eup %1427 }
 0x4b1   :  { %v453_v23 = vmul.f32 %v1428_v18, %v451_v22 }
 0x514   :  { %v456_v19 = vpop.permute.xlu0 %455 }
 0x515   :  { %v458_v21 = vmul.f32 %v1428_v18, %v456_v19 }
 0x517   :  { %460 = vrot.lane.b32.xlu1 %v458_v21, %s1508_s21 }
 0x589   :  { %v461_v24 = vpop.permute.xlu1 %460 }
 0x58a   :  { %v463_v25 = vadd.f32 %v461_v24, %v453_v23 }
 0x58c   :  { %1429 = vtanh.f32 %v463_v25  ;;  %v558_v42 = vrot.slane %v463_v25, 6 }
 0x596   :  { %v1430_v26 = vpop.eup %1429 }
 0x597   :  { %466 = vrot.lane.b32.xlu0 %v1430_v26, %s1507_s4 }
 0x609   :  { %v467_v27 = vpop.permute.xlu0 %466 }
 0x60a   :  { %v469_v28 = vmul.f32 %v1428_v18, %v467_v27 }
 0x60c   :  { %v471_v29 = vrot.slane %v469_v28, 2 }
 0x60e   :  { %472 = vrot.lane.b32.xlu1 %v471_v29, %s1508_s21 }
 0x680   :  { %v473_v30 = vpop.permute.xlu1 %472 }
 0x681   :  { %1287 = vmatmul.mubr.msk.f32.vlgmr.msra.gmra.mrb[14].mxu0 %vm265_vm6, %v473_v30 }
 0x682   :  { %1385 = vmatpush3.bf16.msra.mxu0 %v1604_v17  ;;  %1308 = vmatprep.mubr.msk.f32.mxu0 %vm1504_vm0, %v1505_v4 }
 0x683   :  { %1386 = vmatprep.subr.bf16.mxu0 %v1503_v2 }
 0x686   :  { %1388 = vmatpush3.bf16.msra.mxu0 %v1614_v20 }
 0x687   :  { %1395 = vmatprep.subr.bf16.mxu0 %v1503_v2 }
 0x754   :  { %v542_v31 = vpop.f32.mrb[14].mxu0 }
 0x755   :  { %v547_v32 = vrot.slane %v542_v31, 4  ;;  %v1288_v33 = vpop.f32.mrb[15].mxu0 }
 0x757   :  { %v549_v34 = vadd.f32 %v547_v32, %v1641_v53 }
 0x759   :  { %1431 = vtanh.f32 %v549_v34  ;;  %v1145_v36 = vmul.f32 -1.442695, %v549_v34 }
 0x75b   :  { %1433 = vpow2.f32 %v1145_v36 }
 0x763   :  { %v1432_v35 = vpop.eup %1431 }
 0x764   :  { %562 = vrot.lane.b32.xlu0 %v1432_v35, %s1507_s4 }
 0x765   :  { %v1434_v37 = vpop.eup %1433 }
 0x766   :  { %v553_v38 = vadd.f32 1.0, %v1434_v37 }
 0x768   :  { %1435 = vrcp.f32 %v553_v38 }
 0x772   :  { %v1436_v39 = vpop.eup %1435 }
 0x773   :  { %v560_v43 = vmul.f32 %v1436_v39, %v558_v42 }
 0x7d6   :  { %v563_v40 = vpop.permute.xlu0 %562 }
 0x7d7   :  { %v565_v41 = vmul.f32 %v1436_v39, %v563_v40 }
 0x7d9   :  { %567 = vrot.lane.b32.xlu1 %v565_v41, %s1508_s21 }
 0x84b   :  { %v568_v44 = vpop.permute.xlu1 %567 }
 0x84c   :  { %v570_v45 = vadd.f32 %v568_v44, %v560_v43 }
 0x84e   :  { %1437 = vtanh.f32 %v570_v45  ;;  %v665_v0 = vrot.slane %v570_v45, 6 }
 0x858   :  { %v1438_v46 = vpop.eup %1437 }
 0x859   :  { %573 = vrot.lane.b32.xlu0 %v1438_v46, %s1507_s4 }
 0x8cb   :  { %v574_v47 = vpop.permute.xlu0 %573 }
 0x8cc   :  { %v576_v48 = vmul.f32 %v1436_v39, %v574_v47 }
 0x8ce   :  { %v578_v49 = vrot.slane %v576_v48, 4 }
 0x8d0   :  { %579 = vrot.lane.b32.xlu1 %v578_v49, %s1508_s21 }
 0x942   :  { %v580_v50 = vpop.permute.xlu1 %579 }
 0x943   :  { %1298 = vmatmul.mubr.msk.f32.vlgmr.msra.gmra.mrb[6].mxu1 %vm265_vm6, %v580_v50 }
 0x944   :  { %1391 = vmatpush3.bf16.msra.mxu1 %v1604_v17  ;;  %1319 = vmatprep.mubr.msk.f32.mxu1 %vm1504_vm0, %v1505_v4 }
 0x945   :  { %1392 = vmatprep.subr.bf16.mxu1 %v1503_v2 }
 0x948   :  { %1394 = vmatpush3.bf16.msra.mxu1 %v1614_v20 }
 0x949   :  { %1401 = vmatprep.subr.bf16.mxu1 %v1503_v2 }
 0xa16   :  { %v649_v51 = vpop.f32.mrb[6].mxu1 }
 0xa17   :  { %v654_v54 = vrot.slane %v649_v51, 2  ;;  %v1299_v55 = vpop.f32.mrb[7].mxu1 }
 0xa19   :  { %v656_v56 = vadd.f32 %v654_v54, %v1641_v53 }
 0xa1b   :  { %1439 = vtanh.f32 %v656_v56  ;;  %v1147_v58 = vmul.f32 -1.442695, %v656_v56 }
 0xa1d   :  { %1441 = vpow2.f32 %v1147_v58 }
 0xa25   :  { %v1440_v57 = vpop.eup %1439 }
 0xa26   :  { %669 = vrot.lane.b32.xlu0 %v1440_v57, %s1507_s4 }
 0xa27   :  { %v1442_v59 = vpop.eup %1441 }
 0xa28   :  { %v660_v60 = vadd.f32 1.0, %v1442_v59 }
 0xa2a   :  { %1443 = vrcp.f32 %v660_v60 }
 0xa34   :  { %v1444_v61 = vpop.eup %1443 }
 0xa35   :  { %v667_v1 = vmul.f32 %v1444_v61, %v665_v0 }
 0xa98   :  { %v670_v62 = vpop.permute.xlu0 %669 }
 0xa99   :  { %v672_v63 = vmul.f32 %v1444_v61, %v670_v62 }
 0xa9b   :  { %674 = vrot.lane.b32.xlu1 %v672_v63, %s1508_s21 }
 0xb0d   :  { %v675_v3 = vpop.permute.xlu1 %674 }
 0xb0e   :  { %v677_v5 = vadd.f32 %v675_v3, %v667_v1 }
 0xb10   :  { %1445 = vtanh.f32 %v677_v5  ;;  %v769_v22 = vrot.slane %v677_v5, 6 }
 0xb1a   :  { %v1446_v53 = vpop.eup %1445 }
 0xb1b   :  { %680 = vrot.lane.b32.xlu0 %v1446_v53, %s1507_s4 }
 0xb8d   :  { %v681_v6 = vpop.permute.xlu0 %680 }
 0xb8e   :  { %v683_v7 = vmul.f32 %v1444_v61, %v681_v6 }
 0xb90   :  { %v685_v8 = vrot.slane %v683_v7, 6 }
 0xb92   :  { %686 = vrot.lane.b32.xlu1 %v685_v8, %s1508_s21 }
 0xc04   :  { %v687_v9 = vpop.permute.xlu1 %686 }
 0xc05   :  { %1309 = vmatmul.mubr.msk.f32.vlgmr.msra.gmra.mrb[16].mxu0 %vm265_vm6, %v687_v9 }
 0xc06   :  { %1397 = vmatpush3.bf16.msra.mxu0 %v1604_v17  ;;  %1330 = vmatprep.mubr.msk.f32.mxu0 %vm1504_vm0, %v1505_v4 }
 0xc07   :  { %1398 = vmatprep.subr.bf16.mxu0 %v1503_v2 }
 0xc0a   :  { %1400 = vmatpush3.bf16.msra.mxu0 %v1614_v20 }
 0xcd8   :  { %v756_v10 = vpop.f32.mrb[16].mxu0 }
 0xcd9   :  { %v760_v11 = vadd.f32 %v1639_v52, %v756_v10  ;;  %v1310_v12 = vpop.f32.mrb[17].mxu0 }
 0xcdb   :  { %1447 = vtanh.f32 %v760_v11  ;;  %v1149_v14 = vmul.f32 -1.442695, %v760_v11 }
 0xcdd   :  { %1449 = vpow2.f32 %v1149_v14 }
 0xce5   :  { %v1448_v13 = vpop.eup %1447 }
 0xce6   :  { %773 = vrot.lane.b32.xlu0 %v1448_v13, %s1507_s4 }
 0xce7   :  { %v1450_v15 = vpop.eup %1449 }
 0xce8   :  { %v764_v16 = vadd.f32 1.0, %v1450_v15 }
 0xcea   :  { %1451 = vrcp.f32 %v764_v16 }
 0xcf4   :  { %v1452_v18 = vpop.eup %1451 }
 0xcf5   :  { %v771_v23 = vmul.f32 %v1452_v18, %v769_v22 }
 0xd58   :  { %v774_v19 = vpop.permute.xlu0 %773 }
 0xd59   :  { %v776_v21 = vmul.f32 %v1452_v18, %v774_v19 }
 0xd5b   :  { %778 = vrot.lane.b32.xlu1 %v776_v21, %s1508_s21 }
 0xdcd   :  { %v779_v24 = vpop.permute.xlu1 %778 }
 0xdce   :  { %v781_v25 = vadd.f32 %v779_v24, %v771_v23 }
 0xdd0   :  { %1453 = vtanh.f32 %v781_v25 }
 0xdda   :  { %v1454_v26 = vpop.eup %1453 }
 0xddb   :  { %784 = vrot.lane.b32.xlu0 %v1454_v26, %s1507_s4 }
 0xe4d   :  { %v785_v27 = vpop.permute.xlu0 %784 }
 0xe4e   :  { %v787_v28 = vmul.f32 %v1452_v18, %v785_v27 }
 0xe50   :  { %789 = vrot.lane.b32.xlu1 %v787_v28, %s1508_s21 }
 0xec2   :  { %v790_v29 = vpop.permute.xlu1 %789 }
 0xec3   :  { %1320 = vmatmul.mubr.msk.f32.vlgmr.msra.gmra.mrb[8].mxu1 %vm265_vm6, %v790_v29 }
 0xec4   :  { %1403 = vmatpush3.bf16.msra.mxu1 %v1604_v17  ;;  %1341 = vmatprep.mubr.msk.f32.mxu1 %vm1504_vm0, %v1505_v4 }
 0xec5   :  { %1404 = vmatprep.subr.bf16.mxu1 %v1503_v2  ;;  %v875_v2 = vrot.slane %v781_v25, 6 }
 0xec8   :  { %1406 = vmatpush3.bf16.msra.mxu1 %v1614_v20 }
 0xf96   :  { %v859_v30 = vpop.f32.mrb[8].mxu1 }
 0xf97   :  { %v864_v31 = vrot.slane %v859_v30, 6  ;;  %v1321_v32 = vpop.f32.mrb[9].mxu1 }
 0xf99   :  { %v866_v33 = vadd.f32 %v1639_v52, %v864_v31 }
 0xf9b   :  { %1455 = vtanh.f32 %v866_v33  ;;  %v1151_v35 = vmul.f32 -1.442695, %v866_v33 }
 0xf9d   :  { %1457 = vpow2.f32 %v1151_v35 }
 0xfa5   :  { %v1456_v34 = vpop.eup %1455 }
 0xfa6   :  { %879 = vrot.lane.b32.xlu0 %v1456_v34, %s1507_s4 }
 0xfa7   :  { %v1458_v36 = vpop.eup %1457 }
 0xfa8   :  { %v870_v17 = vadd.f32 1.0, %v1458_v36 }
 0xfaa   :  { %1459 = vrcp.f32 %v870_v17 }
 0xfb4   :  { %v1460_v37 = vpop.eup %1459 }
 0xfb5   :  { %v877_v20 = vmul.f32 %v1460_v37, %v875_v2 }
0x1018   :  { %v880_v4 = vpop.permute.xlu0 %879 }
0x1019   :  { %v882_v38 = vmul.f32 %v1460_v37, %v880_v4 }
0x101b   :  { %884 = vrot.lane.b32.xlu1 %v882_v38, %s1508_s21 }
0x108d   :  { %v885_v39 = vpop.permute.xlu1 %884 }
0x108e   :  { %v887_v40 = vadd.f32 %v885_v39, %v877_v20 }
0x1090   :  { %1461 = vtanh.f32 %v887_v40  ;;  %v982_v59 = vrot.slane %v887_v40, 6 }
0x109a   :  { %v1462_v41 = vpop.eup %1461 }
0x109b   :  { %890 = vrot.lane.b32.xlu0 %v1462_v41, %s1507_s4 }
0x110d   :  { %v891_v42 = vpop.permute.xlu0 %890 }
0x110e   :  { %v893_v43 = vmul.f32 %v1460_v37, %v891_v42 }
0x1110   :  { %v895_v44 = vrot.slane %v893_v43, 2 }
0x1112   :  { %896 = vrot.lane.b32.xlu1 %v895_v44, %s1508_s21 }
0x1184   :  { %v897_v45 = vpop.permute.xlu1 %896 }
0x1185   :  { %1331 = vmatmul.mubr.msk.f32.vlgmr.msra.gmra.mrb[18].mxu0 %vm265_vm6, %v897_v45 }
0x1258   :  { %v966_v46 = vpop.f32.mrb[18].mxu0 }
0x1259   :  { %v971_v47 = vrot.slane %v966_v46, 4  ;;  %v1332_v48 = vpop.f32.mrb[19].mxu0 }
0x125b   :  { %v973_v49 = vadd.f32 %v1639_v52, %v971_v47 }
0x125d   :  { %1463 = vtanh.f32 %v973_v49  ;;  %v1153_v51 = vmul.f32 -1.442695, %v973_v49 }
0x125f   :  { %1465 = vpow2.f32 %v1153_v51 }
0x1267   :  { %v1464_v50 = vpop.eup %1463 }
0x1268   :  { %986 = vrot.lane.b32.xlu0 %v1464_v50, %s1507_s4 }
0x1269   :  { %v1466_v54 = vpop.eup %1465 }
0x126a   :  { %v977_v55 = vadd.f32 1.0, %v1466_v54 }
0x126c   :  { %1467 = vrcp.f32 %v977_v55 }
0x1276   :  { %v1468_v56 = vpop.eup %1467 }
0x1277   :  { %v984_v60 = vmul.f32 %v1468_v56, %v982_v59 }
0x12da   :  { %v987_v57 = vpop.permute.xlu0 %986 }
0x12db   :  { %v989_v58 = vmul.f32 %v1468_v56, %v987_v57 }
0x12dd   :  { %991 = vrot.lane.b32.xlu1 %v989_v58, %s1508_s21 }
0x134f   :  { %v992_v61 = vpop.permute.xlu1 %991 }
0x1350   :  { %v994_v62 = vadd.f32 %v992_v61, %v984_v60 }
0x1352   :  { %1469 = vtanh.f32 %v994_v62  ;;  %v1089_v16 = vrot.slane %v994_v62, 6 }
0x135c   :  { %v1470_v63 = vpop.eup %1469 }
0x135d   :  { %997 = vrot.lane.b32.xlu0 %v1470_v63, %s1507_s4 }
0x13cf   :  { %v998_v0 = vpop.permute.xlu0 %997 }
0x13d0   :  { %v1000_v1 = vmul.f32 %v1468_v56, %v998_v0 }
0x13d2   :  { %v1002_v3 = vrot.slane %v1000_v1, 4 }
0x13d4   :  { %1003 = vrot.lane.b32.xlu1 %v1002_v3, %s1508_s21 }
0x1446   :  { %v1004_v5 = vpop.permute.xlu1 %1003 }
0x1447   :  { %1342 = vmatmul.mubr.msk.f32.vlgmr.msra.gmra.mrb[10].mxu1 %vm265_vm6, %v1004_v5 }
0x151a   :  { %v1073_v53 = vpop.f32.mrb[10].mxu1 }
0x151b   :  { %v1078_v6 = vrot.slane %v1073_v53, 2  ;;  %v1343_v7 = vpop.f32.mrb[11].mxu1 }
0x151d   :  { %v1080_v8 = vadd.f32 %v1639_v52, %v1078_v6 }
0x151f   :  { %1471 = vtanh.f32 %v1080_v8  ;;  %v1155_v10 = vmul.f32 -1.442695, %v1080_v8 }
0x1521   :  { %1473 = vpow2.f32 %v1155_v10 }
0x1529   :  { %v1472_v9 = vpop.eup %1471 }
0x152a   :  { %1093 = vrot.lane.b32.xlu0 %v1472_v9, %s1507_s4 }
0x152b   :  { %v1474_v11 = vpop.eup %1473 }
0x152c   :  { %v1084_v12 = vadd.f32 1.0, %v1474_v11 }
0x152e   :  { %1475 = vrcp.f32 %v1084_v12 }
0x1538   :  { %v1476_v13 = vpop.eup %1475 }
0x1539   :  { %v1091_v18 = vmul.f32 %v1476_v13, %v1089_v16 }
0x159c   :  { %v1094_v14 = vpop.permute.xlu0 %1093 }
0x159d   :  { %v1096_v15 = vmul.f32 %v1476_v13, %v1094_v14 }
0x159f   :  { %1098 = vrot.lane.b32.xlu1 %v1096_v15, %s1508_s21 }
0x1611   :  { %v1099_v19 = vpop.permute.xlu1 %1098 }
0x1612   :  { %v1101_v21 = vadd.f32 %v1099_v19, %v1091_v18 }
0x1614   :  { %1477 = vtanh.f32 %v1101_v21 }
0x161e   :  { %v1478_v52 = vpop.eup %1477 }
0x161f   :  { %1104 = vrot.lane.b32.xlu0 %v1478_v52, %s1507_s4 }
0x1691   :  { %v1105_v22 = vpop.permute.xlu0 %1104 }
0x1692   :  { %v1107_v23 = vmul.f32 %v1476_v13, %v1105_v22 }
0x1694   :  { %1109 = vrot.lane.b32.xlu1 %v1107_v23, %s1508_s21 }
0x1706   :  { %v1110_v24 = vpop.permute.xlu1 %1109 }
0x1707   :  { %1113 = vst.msk [vmem:[#allocation2 - $0x6] sm:$0xc0] %vm1112_vm7, %v1110_v24 }
0x1708   :  { %1490 = shalt.err (!%p1487_p4)
}
0x1709   :  { %s1491_s26 = scalar_lea.hbm %s1735_s5, 32 }
0x170a   :  { %p1492_p5 = scmp.ne.s32.totalorder %s1735_s5, %s1491_s26  ;;  %p1495_p6 = scmp.lt.u32.totalorder %s1491_s26, %s1735_s5 }
0x170c   :  { %p1497_p7 = pnand %p1495_p6, %p1492_p5 }
0x170e   :  { %1500 = shalt.err (!%p1497_p7)
}
0x170f   :  { %1123 = dma.vmem_to_hbm [thread:$0]  %s1121_s23, 32, %s1735_s5, [#allocation3]  }
0x1710   :  { %1501 = dma.done.wait [#allocation3], 32  }
0x1711   :  { %1502 = vsyncadd [#allocation3], 4294967264 }
0x1712   :  { %1127 = vsyncpa [#allocation3], 1 }

</bundles_post_ra>
